<compile_context>
chip_gen: v5e
topology: v5e:2x2
jax: 0.10.0
libtpu: 0.0.40
codegen_flags: <defaults>
</compile_context>

<pallas_src>
import functools

import numpy as np

import jax
import jax.numpy as jnp
from jax import lax
from jax.experimental import pallas as pl
from jax.experimental.pallas import tpu as pltpu

INV_SQRT_2 = 1.0 / (2.0 ** 0.5)


def _silu(x):
    return x * jax.nn.sigmoid(x)


def _round_up(n, m):
    return ((n + m - 1) // m) * m


# ---------------------------------------------------------------------------
# Kernel 1: per-edge MLP chain (tiled over edge rows, "parallel").
# scale_rbf is pre-folded into w_rbf in the wrapper.
# ---------------------------------------------------------------------------
def edge_kernel(m_st_ref, rbf_ref, w_mkt_ref, w_rbf_ref, w_down_ref, out_ref,
                *, precision):
    m_kt = _silu(jnp.dot(m_st_ref[...], w_mkt_ref[...],
                         preferred_element_type=jnp.float32, precision=precision))
    rbf_emb = jnp.dot(rbf_ref[...], w_rbf_ref[...],
                      preferred_element_type=jnp.float32, precision=precision)
    m_kt = m_kt * rbf_emb                         # ScaleFactor folded into w_rbf
    out_ref[...] = _silu(jnp.dot(m_kt, w_down_ref[...],
                                 preferred_element_type=jnp.float32,
                                 precision=precision))


# ---------------------------------------------------------------------------
# Kernel 2: per-triplet efficient bilinear (tiled over triplet rows, "parallel").
#   y[t, o] = sum_{c,i} m_t[t,c] * basis[t,i] * W[c,i,o]
# computed as one lane-dense outer product (tile_t, C*I) followed by a single
# 256-deep MXU matmul against W flattened to (C*I, O). scale_cbf is folded into W.
# ---------------------------------------------------------------------------
def triplet_kernel(m_t_ref, rbfw_ref, sph_ref, w_bil_ref, out_ref, *, precision):
    t_t, n_c = m_t_ref.shape
    n_i = rbfw_ref.shape[1]
    basis = rbfw_ref[...] * sph_ref[...]                             # (t_t, I)
    op = (m_t_ref[...][:, :, None] * basis[:, None, :]).reshape(t_t, n_c * n_i)
    out_ref[...] = jnp.dot(op, w_bil_ref[...],
                           preferred_element_type=jnp.float32, precision=precision)


# ---------------------------------------------------------------------------
# Kernel 3: fused up-projections + merge (tiled over edge rows, "parallel").
# x_sw = x[idx_swap] is pre-gathered in the wrapper (row gather commutes with the
# element-wise silu after the linear). The two projections are packed into one
# block-diagonal weight so a single matmul produces a 2*d_edge-lane tile.
# ---------------------------------------------------------------------------
def out_kernel(x_ref, xsw_ref, w_blk_ref, out_ref, *, precision):
    d_out = out_ref.shape[1]
    xx = jnp.concatenate([x_ref[...], xsw_ref[...]], axis=1)          # (tile_e, 2*d_trip)
    h = _silu(jnp.dot(xx, w_blk_ref[...],
                      preferred_element_type=jnp.float32, precision=precision))
    out_ref[...] = (h[:, :d_out] + h[:, d_out:]) * INV_SQRT_2


# ---------------------------------------------------------------------------
# Wrapper
# ---------------------------------------------------------------------------
def triplet_interaction_pallas(params, m_st, rbf, cbf, idx_swap, id3_kt,
                               id3_st, id3_ragged_idx, *, tile_e=256, tile_t=256,
                               precision=lax.Precision.DEFAULT):
    # id3_ragged_idx is only needed for GemNet's Kmax zero-padded layout; the
    # segment-sum formulation used here is mathematically equivalent.
    del id3_ragged_idx
    rbf_w, sph = cbf
    E, d_edge = m_st.shape
    d_rbf = rbf.shape[1]
    d_trip = params["w_down"].shape[1]
    d_cbf = rbf_w.shape[1]
    T = id3_st.shape[0]
    f32 = jnp.float32

    # clamp tile sizes for small problems; keep row tiles multiples of 8
    tile_e = min(tile_e, _round_up(E, 8))
    E_pad = _round_up(E, tile_e)

    # fold ScaleFactor(scale_rbf) into the rbf projection weight (free at trace time)
    w_mkt = params["w_mkt"].astype(f32)
    w_rbf = (params["w_rbf"] * params["scale_rbf"]).astype(f32)
    w_down = params["w_down"].astype(f32)

    m_st_p = jnp.pad(m_st.astype(f32), ((0, E_pad - E), (0, 0)))
    rbf_p = jnp.pad(rbf.astype(f32), ((0, E_pad - E), (0, 0)))

    # ---- stage 1: edge MLP chain ----
    m_down = pl.pallas_call(
        functools.partial(edge_kernel, precision=precision),
        out_shape=jax.ShapeDtypeStruct((E_pad, d_trip), f32),
        grid=(E_pad // tile_e,),
        in_specs=[
            pl.BlockSpec((tile_e, d_edge), lambda i: (i, 0)),
            pl.BlockSpec((tile_e, d_rbf), lambda i: (i, 0)),
            pl.BlockSpec((d_edge, d_edge), lambda i: (0, 0)),
            pl.BlockSpec((d_rbf, d_edge), lambda i: (0, 0)),
            pl.BlockSpec((d_edge, d_trip), lambda i: (0, 0)),
        ],
        out_specs=pl.BlockSpec((tile_e, d_trip), lambda i: (i, 0)),
        compiler_params=pltpu.CompilerParams(dimension_semantics=("parallel",)),
    )(m_st_p, rbf_p, w_mkt, w_rbf, w_down)

    # ---- stage 2: triplet bilinear (dense part in Pallas, gather/scatter in XLA) ----
    if T != 0:
        tt = min(tile_t, _round_up(T, 8))
        T_pad = _round_up(T, tt)

        # row gather replaces the old O(T*E) one-hot MXU matmul
        m_t = jnp.take(m_down, id3_kt.astype(jnp.int32), axis=0)       # (T, d_trip)
        m_t = jnp.pad(m_t, ((0, T_pad - T), (0, 0)))
        rbf_w_p = jnp.pad(rbf_w.astype(f32), ((0, T_pad - T), (0, 0)))
        sph_p = jnp.pad(sph.astype(f32), ((0, T_pad - T), (0, 0)))

        # fold ScaleFactor(scale_cbf_sum) into the bilinear weight; flatten (C,I,O)->(C*I,O)
        w_bil_flat = (params["w_bil"] * params["scale_cbf"]).astype(f32).reshape(
            d_trip * d_cbf, d_trip)

        y = pl.pallas_call(
            functools.partial(triplet_kernel, precision=precision),
            out_shape=jax.ShapeDtypeStruct((T_pad, d_trip), f32),
            grid=(T_pad // tt,),
            in_specs=[
                pl.BlockSpec((tt, d_trip), lambda t: (t, 0)),
                pl.BlockSpec((tt, d_cbf), lambda t: (t, 0)),
                pl.BlockSpec((tt, d_cbf), lambda t: (t, 0)),
                pl.BlockSpec((d_trip * d_cbf, d_trip), lambda t: (0, 0)),
            ],
            out_specs=pl.BlockSpec((tt, d_trip), lambda t: (t, 0)),
            compiler_params=pltpu.CompilerParams(dimension_semantics=("parallel",)),
        )(m_t, rbf_w_p, sph_p, w_bil_flat)

        # TODO(synk): the triplet->edge segment sum is left to XLA; an in-kernel
        # version would sort triplets by id3_st and use PrefetchScalarGridSpec
        # group offsets (MoE/megablox pattern) to accumulate per edge tile.
        x = jnp.zeros((E_pad, d_trip), f32).at[id3_st.astype(jnp.int32)].add(y[:T])
    else:
        x = m_down   # matches the `id3_st.numel() == 0` branch of the module

    # ---- stage 3: fused up-projections + swap merge ----
    # silu(x @ W_ts)[idx_swap] == silu(x[idx_swap] @ W_ts), so pre-gather the rows.
    idx_swap_p = jnp.pad(idx_swap.astype(jnp.int32), (0, E_pad - E))
    x_sw = jnp.take(x, idx_swap_p, axis=0)

    # block-diagonal packing of the two projections -> one matmul, 2x lane width
    w_blk = jnp.zeros((2 * d_trip, 2 * d_edge), f32)
    w_blk = w_blk.at[:d_trip, :d_edge].set(params["w_st"].astype(f32))
    w_blk = w_blk.at[d_trip:, d_edge:].set(params["w_ts"].astype(f32))

    x3 = pl.pallas_call(
        functools.partial(out_kernel, precision=precision),
        out_shape=jax.ShapeDtypeStruct((E_pad, d_edge), f32),
        grid=(E_pad // tile_e,),
        in_specs=[
            pl.BlockSpec((tile_e, d_trip), lambda i: (i, 0)),
            pl.BlockSpec((tile_e, d_trip), lambda i: (i, 0)),
            pl.BlockSpec((2 * d_trip, 2 * d_edge), lambda i: (0, 0)),
        ],
        out_specs=pl.BlockSpec((tile_e, d_edge), lambda i: (i, 0)),
        compiler_params=pltpu.CompilerParams(dimension_semantics=("parallel",)),
    )(x, x_sw, w_blk)

    return x3[:E]


# ---------------------------------------------------------------------------
# Pure-JAX reference (fp32 math, faithful to the PyTorch module) for verification.
# ---------------------------------------------------------------------------
def reference_forward(params, m_st, rbf, cbf, idx_swap, id3_kt, id3_st,
                      id3_ragged_idx, *, precision=lax.Precision.HIGHEST):
    del id3_ragged_idx
    mm = functools.partial(jnp.dot, precision=precision)
    rbf_w, sph = cbf
    E = m_st.shape[0]

    m_kt = _silu(mm(m_st, params["w_mkt"]))
    m_kt = m_kt * mm(rbf, params["w_rbf"]) * params["scale_rbf"]
    m_kt = _silu(mm(m_kt, params["w_down"]))

    if id3_st.shape[0] != 0:
        m_t = m_kt[id3_kt]
        basis = rbf_w * sph
        y = jnp.einsum("ti,tc,cio->to", basis, m_t, params["w_bil"],
                       precision=precision)
        x = jnp.zeros((E, y.shape[1]), jnp.float32).at[id3_st].add(y)
        x = x * params["scale_cbf"]
    else:
        x = m_kt

    x_st = _silu(mm(x, params["w_st"]))
    x_ts = _silu(mm(x, params["w_ts"]))[idx_swap]
    return (x_st + x_ts) * INV_SQRT_2


if __name__ == "__main__":
    key = jax.random.PRNGKey(0)

    E = 16        # number of directed edges
    T = 42        # number of triplets (non-multiple of 8 -> exercises padding)
    D_edge = 32   # emb_size_edge
    D_rbf = 16    # emb_size_rbf
    D_cbf = 16    # emb_size_cbf
    D_trip = 16   # emb_triplet

    ks = jax.random.split(key, 12)

    def _w(k, shape, fan_in):
        return (jax.random.normal(k, shape, jnp.float32) / np.sqrt(fan_in)
                ).astype(jnp.float32)

    params = {
        "w_mkt": _w(ks[0], (D_edge, D_edge), D_edge),
        "w_rbf": _w(ks[1], (D_rbf, D_edge), D_rbf),
        "w_down": _w(ks[2], (D_edge, D_trip), D_edge),
        "w_bil": _w(ks[3], (D_trip, D_cbf, D_trip), D_trip * D_cbf),
        "w_st": _w(ks[4], (D_trip, D_edge), D_trip),
        "w_ts": _w(ks[5], (D_trip, D_edge), D_trip),
        "scale_rbf": 0.75,     # ScaleFactor() -- deterministic synthetic value
        "scale_cbf": 1.25,     # ScaleFactor()
    }

    m_st = jax.random.normal(ks[6], (E, D_edge), jnp.float32)
    rbf = jax.random.normal(ks[7], (E, D_rbf), jnp.float32)
    rbf_w = jax.random.normal(ks[8], (T, D_cbf), jnp.float32)
    sph = jax.random.normal(ks[9], (T, D_cbf), jnp.float32)
    cbf = (rbf_w, sph)

    idx_swap = jnp.arange(E, dtype=jnp.int32).reshape(E // 2, 2)[:, ::-1].reshape(E)
    id3_kt = jax.random.randint(ks[10], (T,), 0, E, dtype=jnp.int32)
    id3_st = jax.random.randint(ks[11], (T,), 0, E, dtype=jnp.int32)

    # within-target-edge rank of each triplet (unused by the segment-sum
    # formulation but constructed for interface faithfulness)
    id3_st_np = np.asarray(id3_st)
    ragged = np.zeros(T, np.int32)
    counts = {}
    for i, e in enumerate(id3_st_np):
        ragged[i] = counts.get(int(e), 0)
        counts[int(e)] = int(ragged[i]) + 1
    id3_ragged_idx = jnp.asarray(ragged)

    ref = reference_forward(params, m_st, rbf, cbf, idx_swap, id3_kt, id3_st,
                            id3_ragged_idx, precision=lax.Precision.HIGHEST)

    # 1) exact-math check: kernel at HIGHEST matmul precision vs fp32 reference
    out_hi = triplet_interaction_pallas(params, m_st, rbf, cbf, idx_swap,
                                        id3_kt, id3_st, id3_ragged_idx,
                                        precision=lax.Precision.HIGHEST)
    out_hi = jax.block_until_ready(out_hi)
    np.testing.assert_allclose(np.asarray(out_hi), np.asarray(ref),
                               rtol=1e-4, atol=1e-4)

    # 2) production path: default precision (single bf16 MXU pass) — loose check
    #    only because MXU inputs are truncated to bf16.
    out_fast = triplet_interaction_pallas(params, m_st, rbf, cbf, idx_swap,
                                          id3_kt, id3_st, id3_ragged_idx)
    out_fast = jax.block_until_ready(out_fast)
    np.testing.assert_allclose(np.asarray(out_fast), np.asarray(ref),
                               rtol=1e-1, atol=1e-1)

    print("KERNEL_OK")
</pallas_src>

<mosaic_0001>
module attributes {stable_mosaic.version = 11 : i64} {
  func.func @edge_kernel(%arg0: i32, %arg1: memref<16x32xf32, #tpu.memory_space<vmem>>, %arg2: memref<16x16xf32, #tpu.memory_space<vmem>>, %arg3: memref<32x32xf32, #tpu.memory_space<vmem>>, %arg4: memref<16x32xf32, #tpu.memory_space<vmem>>, %arg5: memref<32x16xf32, #tpu.memory_space<vmem>>, %arg6: memref<16x16xf32, #tpu.memory_space<vmem>>) attributes {dimension_semantics = [#tpu.dimension_semantics<parallel>], iteration_bounds = array<i64: 1>, scalar_prefetch = 0 : i64, scratch_operands = 0 : i64, tpu.core_type = #tpu.core_type<tc>, window_params = [{transform_indices = @transform_0, window_bounds = array<i64: 16, 32>}, {transform_indices = @transform_1, window_bounds = array<i64: 16, 16>}, {pipeline_mode = #tpu.pipeline_mode<synchronous>, transform_indices = @transform_2, window_bounds = array<i64: 32, 32>}, {pipeline_mode = #tpu.pipeline_mode<synchronous>, transform_indices = @transform_3, window_bounds = array<i64: 16, 32>}, {pipeline_mode = #tpu.pipeline_mode<synchronous>, transform_indices = @transform_4, window_bounds = array<i64: 32, 16>}, {transform_indices = @transform_5, window_bounds = array<i64: 16, 16>}]} {
    %c0 = arith.constant 0 : index
    %c0_0 = arith.constant 0 : index
    %0 = vector.load %arg1[%c0, %c0_0] : memref<16x32xf32, #tpu.memory_space<vmem>>, vector<16x32xf32>
    %c0_1 = arith.constant 0 : index
    %c0_2 = arith.constant 0 : index
    %1 = vector.load %arg3[%c0_1, %c0_2] : memref<32x32xf32, #tpu.memory_space<vmem>>, vector<32x32xf32>
    %cst = arith.constant dense<0.000000e+00> : vector<16x32xf32>
    %2 = tpu.matmul %0, %1, %cst {dimension_numbers = #tpu.dot_dimension_numbers<[1], [0], [0], [1], [0, 0, 1, 1], [], []>, precision = #tpu.contract_precision<fp32>} : vector<16x32xf32>, vector<32x32xf32>, vector<16x32xf32> -> vector<16x32xf32>
    %3 = arith.negf %2 : vector<16x32xf32>
    %4 = math.exp %3 : vector<16x32xf32>
    %cst_3 = arith.constant 1.000000e+00 : f32
    %5 = vector.broadcast %cst_3 : f32 to vector<16x32xf32>
    %6 = arith.addf %5, %4 : vector<16x32xf32>
    %7 = arith.divf %5, %6 : vector<16x32xf32>
    %8 = arith.mulf %2, %7 : vector<16x32xf32>
    %c0_4 = arith.constant 0 : index
    %c0_5 = arith.constant 0 : index
    %9 = vector.load %arg2[%c0_4, %c0_5] : memref<16x16xf32, #tpu.memory_space<vmem>>, vector<16x16xf32>
    %c0_6 = arith.constant 0 : index
    %c0_7 = arith.constant 0 : index
    %10 = vector.load %arg4[%c0_6, %c0_7] : memref<16x32xf32, #tpu.memory_space<vmem>>, vector<16x32xf32>
    %cst_8 = arith.constant dense<0.000000e+00> : vector<16x32xf32>
    %11 = tpu.matmul %9, %10, %cst_8 {dimension_numbers = #tpu.dot_dimension_numbers<[1], [0], [0], [1], [0, 0, 1, 1], [], []>, precision = #tpu.contract_precision<fp32>} : vector<16x16xf32>, vector<16x32xf32>, vector<16x32xf32> -> vector<16x32xf32>
    %12 = arith.mulf %8, %11 : vector<16x32xf32>
    %c0_9 = arith.constant 0 : index
    %c0_10 = arith.constant 0 : index
    %13 = vector.load %arg5[%c0_9, %c0_10] : memref<32x16xf32, #tpu.memory_space<vmem>>, vector<32x16xf32>
    %cst_11 = arith.constant dense<0.000000e+00> : vector<16x16xf32>
    %14 = tpu.matmul %12, %13, %cst_11 {dimension_numbers = #tpu.dot_dimension_numbers<[1], [0], [0], [1], [0, 0, 1, 1], [], []>, precision = #tpu.contract_precision<fp32>} : vector<16x32xf32>, vector<32x16xf32>, vector<16x16xf32> -> vector<16x16xf32>
    %15 = arith.negf %14 : vector<16x16xf32>
    %16 = math.exp %15 : vector<16x16xf32>
    %cst_12 = arith.constant 1.000000e+00 : f32
    %17 = vector.broadcast %cst_12 : f32 to vector<16x16xf32>
    %18 = arith.addf %17, %16 : vector<16x16xf32>
    %19 = arith.divf %17, %18 : vector<16x16xf32>
    %20 = arith.mulf %14, %19 : vector<16x16xf32>
    %c0_13 = arith.constant 0 : index
    %c0_14 = arith.constant 0 : index
    %21 = vector.load %arg6[%c0_13, %c0_14] : memref<16x16xf32, #tpu.memory_space<vmem>>, vector<16x16xf32>
    tpu.vector_store %arg6[%c0_13, %c0_14], %20 {strides = array<i32>} : memref<16x16xf32, #tpu.memory_space<vmem>>, vector<16x16xf32>,
    return
  }
  func.func @transform_0(%arg0: i32) -> (i32, i32) {
    %c0_i32 = arith.constant 0 : i32
    %c0_i32_0 = arith.constant 0 : i32
    return %arg0, %c0_i32 : i32, i32
  }
  func.func @transform_1(%arg0: i32) -> (i32, i32) {
    %c0_i32 = arith.constant 0 : i32
    %c0_i32_0 = arith.constant 0 : i32
    return %arg0, %c0_i32 : i32, i32
  }
  func.func @transform_2(%arg0: i32) -> (i32, i32) {
    %c0_i32 = arith.constant 0 : i32
    %c0_i32_0 = arith.constant 0 : i32
    %c0_i32_1 = arith.constant 0 : i32
    return %c0_i32, %c0_i32_0 : i32, i32
  }
  func.func @transform_3(%arg0: i32) -> (i32, i32) {
    %c0_i32 = arith.constant 0 : i32
    %c0_i32_0 = arith.constant 0 : i32
    %c0_i32_1 = arith.constant 0 : i32
    return %c0_i32, %c0_i32_0 : i32, i32
  }
  func.func @transform_4(%arg0: i32) -> (i32, i32) {
    %c0_i32 = arith.constant 0 : i32
    %c0_i32_0 = arith.constant 0 : i32
    %c0_i32_1 = arith.constant 0 : i32
    return %c0_i32, %c0_i32_0 : i32, i32
  }
  func.func @transform_5(%arg0: i32) -> (i32, i32) {
    %c0_i32 = arith.constant 0 : i32
    %c0_i32_0 = arith.constant 0 : i32
    return %arg0, %c0_i32 : i32, i32
  }
}

</mosaic_0001>

<bundles_post_ra>
// kernel: tpu_custom_call.1
= control target key start
LH: loop header
LB: loop body
LE: loop exit
PB: predicated region body
PF: predicated region fallthrough
CT: control target
= control target key end

     0   :  { %10 = vsyncpa [#allocation3], 0  ;;  %s1095_s0 = inlined_call_operand.vmem [shape: f32[16,32], index: 0, kind: input, shape index: {}]   ;;  %s1096_s1 = inlined_call_operand.hbm [shape: f32[16,16], index: 1, kind: input, shape index: {}]   ;;  %s1097_s2 = inlined_call_operand.vmem [shape: f32[32,32], index: 2, kind: input, shape index: {}]   ;;  %s1098_s3 = inlined_call_operand.hbm [shape: f32[16,32], index: 3, kind: input, shape index: {}]   ;;  %s1099_s4 = inlined_call_operand.vmem [shape: f32[32,16], index: 4, kind: input, shape index: {}]   ;;  %s1100_s5 = inlined_call_operand.hbm [shape: f32[16,16], index: 5, kind: output, shape index: {}]  }
   0x1   :  { %11 = vsyncpa [#allocation6], 0 }
   0x2   :  { %12 = vsyncpa [#allocation4], 0  ;;  %s19_s20 = sshll.u32 %s1096_s1, 4  ;;  %s924_s21 = smov [#allocation2]   ;;  %s20_s20 = int_to_ptr.hbm [resolvable:$true] %s19_s20 }
   0x3   :  { %s21_s22 = sshll.u32 %s924_s21, 4  ;;  %s34_s25 = sshll.u32 %s1098_s3, 4  ;;  %s22_s22 = int_to_ptr.vmem [resolvable:$true] %s21_s22  ;;  %s35_s25 = int_to_ptr.hbm [resolvable:$true] %s34_s25 }
   0x4   :  { %s925_s26 = smov 128   ;;  %s926_s27 = smov 8  }
   0x5   :  { %27 = dma.hbm_to_vmem [thread:$0]  %s20_s20, 256, %s22_s22, [#allocation3], %s925_s26, %s925_s26, %s926_s27  }
   0x6   :  { %s927_s28 = smov [#allocation5]  }
   0x7   :  { %s36_s29 = sshll.u32 %s927_s28, 4  ;;  %s37_s29 = int_to_ptr.vmem [resolvable:$true] %s36_s29 }
   0x8   :  { %42 = dma.hbm_to_vmem [thread:$0]  %s35_s25, 256, %s37_s29, [#allocation6], %s925_s26, %s925_s26, %s926_s27  }
   0x9   :  { %918 = dma.done.wait [#allocation3], 256  }
   0xa   :  { %919 = vsyncadd [#allocation3], 4294967040 }
   0xb   :  { %920 = dma.done.wait [#allocation6], 256  }
   0xc   :  { %921 = vsyncadd [#allocation6], 4294967040  ;;  %vm59_vm0 = vcmask 261120   ;;  %v58_v0 = vld [vmem:[%s1097_s2 + $0x18] sm:$0xff]  ;;  %v57_v1 = vld [vmem:[%s1097_s2 + $0x10] sm:$0xff]  ;;  %vm326_vm1 = vcmask 130048  }
   0xd   :  { %v56_v2 = vld [vmem:[%s1097_s2 + $0x8] sm:$0xff]  ;;  %v980_v3 = vand.u32 4294901760, %v58_v0  ;;  %v982_v4 = vand.u32 4294901760, %v57_v1  ;;  %v55_v6 = vld [vmem:[%s1097_s2] sm:$0xff]  ;;  %v325_v16 = vld [vmem:[#allocation5 + $0x8] sm:$0xff]  ;;  %s799_s24 = sshll.u32 %s1100_s5, 4  ;;  %s800_s24 = int_to_ptr.hbm [resolvable:$true] %s799_s24 }
   0xe   :  { %v984_v5 = vand.u32 4294901760, %v56_v2  ;;  %v54_v7 = vld [vmem:[%s1095_s0 + $0x8] sm:$0xff]  ;;  %v53_v8 = vld [vmem:[%s1095_s0] sm:$0xff]  ;;  %v995_v9 = vand.u32 4294901760, %v55_v6  ;;  %v324_v23 = vld [vmem:[#allocation5] sm:$0xff]  ;;  %v1023_v26 = vand.u32 4294901760, %v325_v16 }
   0xf   :  { %v64_v10 = vsel %vm59_vm0, %v54_v7, 0  ;;  %v61_v11 = vsel %vm59_vm0, %v53_v8, 0  ;;  %817 = vmatpush.msra.mxu2 %v980_v3  ;;  %v116_v12 = vsub.f32 %v58_v0, %v980_v3  ;;  %v122_v14 = vsub.f32 %v57_v1, %v982_v4  ;;  %79 = vmatpush.msra.mxu0 %v980_v3  ;;  %v322_v41 = vld [vmem:[#allocation2] sm:$0xff]  ;;  %v323_v50 = vld [vmem:[#allocation2 + $0x8] sm:$0xff]  ;;  %v527_v8 = vld [vmem:[%s1099_s4 + $0x10] sm:$0xff] }
  0x10   :  { %v1001_v13 = vand.u32 4294901760, %v64_v10  ;;  %v1005_v15 = vsub.f32 %v56_v2, %v984_v5  ;;  %v1009_v17 = vsub.f32 %v55_v6, %v995_v9  ;;  %v1011_v18 = vand.u32 4294901760, %v61_v11 }
  0x11   :  { %818 = vmatpush.msra.mxu2 %v982_v4  ;;  %v117_v19 = vand.u32 4294901760, %v116_v12  ;;  %v123_v21 = vand.u32 4294901760, %v122_v14  ;;  %81 = vmatpush.msra.mxu0 %v982_v4  ;;  %v1030_v32 = vand.u32 4294901760, %v324_v23  ;;  %v383_v40 = vsub.f32 %v325_v16, %v1023_v26 }
  0x12   :  { %v1015_v20 = vsub.f32 %v64_v10, %v1001_v13  ;;  %v129_v22 = vand.u32 4294901760, %v1005_v15  ;;  %v135_v24 = vand.u32 4294901760, %v1009_v17  ;;  %v1021_v25 = vsub.f32 %v61_v11, %v1011_v18  ;;  %v526_v11 = vld [vmem:[%s1099_s4 + $0x8] sm:$0xff] }
  0x13   :  { %819 = vmatpush.msra.mxu2 %v984_v5  ;;  %v118_v27 = vsub.f32 %v116_v12, %v117_v19  ;;  %v124_v29 = vsub.f32 %v122_v14, %v123_v21  ;;  %83 = vmatpush.msra.mxu0 %v984_v5  ;;  %v389_v44 = vsub.f32 %v324_v23, %v1030_v32  ;;  %v328_v45 = vsel %vm326_vm1, %v322_v41, 0 }
  0x14   :  { %v96_v28 = vand.u32 4294901760, %v1015_v20  ;;  %v130_v30 = vsub.f32 %v1005_v15, %v129_v22  ;;  %v88_v31 = vand.u32 4294901760, %v1021_v25  ;;  %v136_v36 = vsub.f32 %v1009_v17, %v135_v24 }
  0x15   :  { %820 = vmatpush.msra.mxu2 %v995_v9  ;;  %v119_v33 = vand.u32 4294901760, %v118_v27  ;;  %v125_v35 = vand.u32 4294901760, %v124_v29  ;;  %85 = vmatpush.msra.mxu0 %v995_v9  ;;  %v384_v46 = vand.u32 4294901760, %v383_v40  ;;  %v351_v47 = vand.u32 4294901760, %v328_v45 }
  0x16   :  { %v97_v34 = vsub.f32 %v1015_v20, %v96_v28  ;;  %v89_v37 = vsub.f32 %v1021_v25, %v88_v31  ;;  %v131_v39 = vand.u32 4294901760, %v130_v30  ;;  %v137_v43 = vand.u32 4294901760, %v136_v36 }
  0x17   :  { %162 = vmatpush.msrb.mxu2 %v116_v12  ;;  %231 = vmatpush.msrb.mxu0 %v117_v19  ;;  %v390_v48 = vand.u32 4294901760, %v389_v44  ;;  %v385_v49 = vsub.f32 %v383_v40, %v384_v46  ;;  %v352_v51 = vsub.f32 %v328_v45, %v351_v47  ;;  %v331_v53 = vsel %vm326_vm1, %v323_v50, 0 }
  0x18   :  { %821 = vmatpush.msra.mxu3 %v119_v33  ;;  %v98_v38 = vand.u32 4294901760, %v97_v34  ;;  %120 = vmatpush.msra.mxu1 %v119_v33  ;;  %v90_v42 = vand.u32 4294901760, %v89_v37  ;;  %v359_v57 = vand.u32 4294901760, %v331_v53  ;;  %v549_v10 = vand.u32 4294901760, %v527_v8 }
  0x19   :  { %165 = vmatpush.msrb.mxu2 %v122_v14  ;;  %235 = vmatpush.msrb.mxu0 %v123_v21  ;;  %v391_v52 = vsub.f32 %v389_v44, %v390_v48  ;;  %v386_v54 = vand.u32 4294901760, %v385_v49  ;;  %v353_v55 = vand.u32 4294901760, %v352_v51 }
  0x1a   :  { %99 = vmatmul.f32.vlgmr.msra.gmra.mxu2 %v98_v38  ;;  %822 = vmatpush.msra.mxu3 %v125_v35  ;;  %v360_v59 = vsub.f32 %v331_v53, %v359_v57  ;;  %v591_v14 = vsub.f32 %v527_v8, %v549_v10 }
  0x1b   :  { %168 = vmatpush.msrb.mxu2 %v1005_v15  ;;  %126 = vmatpush.msra.mxu1 %v125_v35  ;;  %v392_v56 = vand.u32 4294901760, %v391_v52  ;;  %v354_v58 = vsub.f32 %v352_v51, %v353_v55  ;;  %v551_v15 = vand.u32 4294901760, %v526_v11 }
  0x1c   :  { %823 = vmatpush.msra.mxu3 %v131_v39  ;;  %91 = vmatmul.f32.vlgmr.msra.gmra.mxu0 %v90_v42  ;;  %v361_v61 = vand.u32 4294901760, %v360_v59  ;;  %v592_v21 = vand.u32 4294901760, %v591_v14 }
  0x1d   :  { %171 = vmatpush.msrb.mxu2 %v1009_v17  ;;  %132 = vmatpush.msra.mxu1 %v131_v39  ;;  %v355_v60 = vand.u32 4294901760, %v354_v58  ;;  %v525_v17 = vld [vmem:[%s1099_s4] sm:$0xff] }
  0x1e   :  { %824 = vmatpush.msra.mxu3 %v137_v43  ;;  %239 = vmatpush.msrb.mxu0 %v129_v22  ;;  %v362_v62 = vsub.f32 %v360_v59, %v361_v61  ;;  %v597_v22 = vsub.f32 %v526_v11, %v551_v15  ;;  %v553_v23 = vand.u32 4294901760, %v525_v17 }
  0x1f   :  { %348 = vmatpush.msra.mxu2 %v1023_v26  ;;  %144 = vmatmul.f32.vlgmr.msra.gmra.mxu3 %v1001_v13 }
  0x20   :  { %138 = vmatpush.msra.mxu1 %v137_v43  ;;  %196 = vmatpush.msrb.mxu3 %v980_v3  ;;  %v363_v63 = vand.u32 4294901760, %v362_v62  ;;  %v598_v27 = vand.u32 4294901760, %v597_v22 }
  0x21   :  { %140 = vmatmul.f32.vlgmr.msra.gmra.mxu1 %v1011_v18  ;;  %243 = vmatpush.msrb.mxu0 %v135_v24 }
  0x22   :  { %266 = vmatpush.msrb.mxu1 %v980_v3  ;;  %174 = vmatmul.f32.vlgmr.msrb.gmra.mxu2 %v1021_v25 }
  0x23   :  { %198 = vmatpush.msrb.mxu3 %v982_v4  ;;  %350 = vmatpush.msra.mxu2 %v1030_v32 }
  0x24   :  { %268 = vmatpush.msrb.mxu1 %v982_v4  ;;  %245 = vmatmul.f32.vlgmr.msrb.gmra.mxu0 %v1011_v18  ;;  %v528_v4 = vld [vmem:[%s1099_s4 + $0x18] sm:$0xff]  ;;  %s928_s4 = smov [#allocation7]  }
  0x25   :  { %200 = vmatpush.msrb.mxu3 %v984_v5  ;;  %482 = vmatpush.msrb.mxu2 %v384_v46  ;;  %s797_s21 = sshll.u32 %s928_s4, 4  ;;  %s798_s21 = int_to_ptr.vmem [resolvable:$true] %s797_s21 }
  0x26   :  { %270 = vmatpush.msrb.mxu1 %v984_v5  ;;  %419 = vmatpush.msra.mxu0 %v383_v40  ;;  %v547_v5 = vand.u32 4294901760, %v528_v4 }
  0x27   :  { %202 = vmatpush.msrb.mxu3 %v995_v9  ;;  %486 = vmatpush.msrb.mxu2 %v390_v48 }
  0x28   :  { %206 = vmatmul.f32.vlgmr.msrb.gmra.mxu3 %v88_v31  ;;  %272 = vmatpush.msrb.mxu1 %v995_v9  ;;  %v585_v9 = vsub.f32 %v528_v4, %v547_v5 }
  0x29   :  { %387 = vmatpush.msra.mxu3 %v386_v54  ;;  %274 = vmatmul.f32.vlgmr.msrb.gmra.mxu1 %v1011_v18 }
  0x2a   :  { %449 = vmatpush.msra.mxu1 %v1023_v26  ;;  %179 = vmatmul.f32.gmra.mxu2 %v1015_v20 }
  0x2b   :  { %393 = vmatpush.msra.mxu3 %v392_v56  ;;  %422 = vmatpush.msra.mxu0 %v389_v44 }
  0x2c   :  { %249 = vmatmul.f32.gmra.mxu0 %v1001_v13  ;;  %451 = vmatpush.msra.mxu1 %v1030_v32 }
  0x2d   :  { %511 = vmatpush.msrb.mxu3 %v1023_v26  ;;  %548 = vmatpush.msrb.mxu0 %v547_v5  ;;  %v593_v26 = vsub.f32 %v591_v14, %v592_v21 }
  0x2f   :  { %513 = vmatpush.msrb.mxu3 %v1030_v32  ;;  %550 = vmatpush.msrb.mxu0 %v549_v10  ;;  %v594_v31 = vand.u32 4294901760, %v593_v26  ;;  %v599_v32 = vsub.f32 %v597_v22, %v598_v27 }
  0x30   :  { %212 = vmatmul.f32.gmra.mxu3 %v96_v28  ;;  %v603_v28 = vsub.f32 %v525_v17, %v553_v23 }
  0x31   :  { %278 = vmatmul.f32.gmra.mxu1 %v1001_v13  ;;  %v586_v13 = vand.u32 4294901760, %v585_v9  ;;  %552 = vmatpush.msrb.mxu0 %v551_v15  ;;  %v600_v36 = vand.u32 4294901760, %v599_v32 }
  0x32   :  { %356 = vmatmul.f32.vlgmr.msra.gmra.mxu2 %v355_v60  ;;  %v604_v33 = vand.u32 4294901760, %v603_v28 }
  0x33   :  { %631 = vmatpush.msra.mxu2 %v585_v9  ;;  %v587_v20 = vsub.f32 %v585_v9, %v586_v13  ;;  %554 = vmatpush.msrb.mxu0 %v553_v23 }
  0x34   :  { %425 = vmatmul.f32.vlgmr.msra.gmra.mxu0 %v352_v51  ;;  %v605_v37 = vsub.f32 %v603_v28, %v604_v33 }
  0x35   :  { %634 = vmatpush.msra.mxu2 %v591_v14  ;;  %v588_v25 = vand.u32 4294901760, %v587_v20  ;;  %700 = vmatpush.msra.mxu0 %v586_v13 }
  0x36   :  { %v606_v42 = vand.u32 4294901760, %v605_v37 }
  0x37   :  { %637 = vmatpush.msra.mxu2 %v597_v22  ;;  %589 = vmatpush.msrb.mxu1 %v588_v25 }
  0x38   :  { %395 = vmatmul.f32.vlgmr.msra.gmra.mxu3 %v351_v47  ;;  %704 = vmatpush.msra.mxu0 %v592_v21 }
  0x39   :  { %455 = vmatmul.f32.vlgmr.msra.gmra.mxu1 %v353_v55  ;;  %665 = vmatpush.msra.mxu3 %v547_v5 }
  0x3a   :  { %364 = vmatmul.f32.gmra.mxu2 %v363_v63  ;;  %595 = vmatpush.msrb.mxu1 %v594_v31 }
  0x3b   :  { %667 = vmatpush.msra.mxu3 %v549_v10  ;;  %640 = vmatpush.msra.mxu2 %v603_v28 }
  0x3c   :  { %430 = vmatmul.f32.gmra.mxu0 %v360_v59  ;;  %601 = vmatpush.msrb.mxu1 %v600_v36 }
  0x3d   :  { %669 = vmatpush.msra.mxu3 %v551_v15  ;;  %708 = vmatpush.msra.mxu0 %v598_v27 }
  0x3e   :  { %607 = vmatpush.msrb.mxu1 %v606_v42 }
  0x3f   :  { %671 = vmatpush.msra.mxu3 %v553_v23  ;;  %712 = vmatpush.msra.mxu0 %v604_v33 }
  0x40   :  { %399 = vmatmul.f32.gmra.mxu3 %v359_v57  ;;  %735 = vmatpush.msra.mxu1 %v547_v5 }
  0x41   :  { %461 = vmatmul.f32.gmra.mxu1 %v361_v61 }
  0x42   :  { %488 = vmatmul.f32.vlgmr.msrb.gmra.mxu2 %v351_v47  ;;  %737 = vmatpush.msra.mxu1 %v549_v10 }
  0x44   :  { %739 = vmatpush.msra.mxu1 %v551_v15 }
  0x46   :  { %741 = vmatpush.msra.mxu1 %v553_v23 }
  0x48   :  { %515 = vmatmul.f32.vlgmr.msrb.gmra.mxu3 %v351_v47 }
  0x4a   :  { %492 = vmatmul.f32.gmra.mxu2 %v359_v57 }
  0x50   :  { %519 = vmatmul.f32.gmra.mxu3 %v359_v57 }
  0x99   :  { %v92_v1 = vpop.f32.mrf.mxu0 }
  0x9d   :  { %v100_v0 = vpop.f32.mrf.mxu2 }
  0x9e   :  { %v141_v3 = vpop.f32.mrf.mxu1 }
  0x9f   :  { %v142_v6 = vadd.f32 %v141_v3, %v92_v1 }
  0xa1   :  { %v246_v12 = vpop.f32.mrf.mxu0 }
  0xa2   :  { %v145_v2 = vpop.f32.mrf.mxu3 }
  0xa3   :  { %v146_v34 = vadd.f32 %v145_v2, %v100_v0 }
  0xa5   :  { %v175_v7 = vpop.f32.mrf.mxu2 }
  0xa6   :  { %v176_v16 = vadd.f32 %v175_v7, %v142_v6  ;;  %v275_v19 = vpop.f32.mrf.mxu1 }
  0xa9   :  { %v250_v41 = vpop.f32.mrf.mxu0 }
  0xab   :  { %v207_v18 = vpop.f32.mrf.mxu3 }
  0xac   :  { %v208_v24 = vadd.f32 %v207_v18, %v176_v16 }
  0xad   :  { %v180_v29 = vpop.f32.mrf.mxu2 }
  0xae   :  { %v247_v30 = vadd.f32 %v246_v12, %v208_v24  ;;  %v181_v38 = vadd.f32 %v180_v29, %v146_v34  ;;  %v279_v44 = vpop.f32.mrf.mxu1 }
  0xb0   :  { %v276_v35 = vadd.f32 %v275_v19, %v247_v30 }
  0xb1   :  { %v426_v53 = vpop.f32.mrf.mxu0 }
  0xb2   :  { %v813_v39 = vmul.f32 -1.442695, %v276_v35 }
  0xb3   :  { %v213_v40 = vpop.f32.mrf.mxu3 }
  0xb4   :  { %830 = vpow2.f32 %v813_v39  ;;  %v214_v43 = vadd.f32 %v213_v40, %v181_v38 }
  0xb5   :  { %v357_v46 = vpop.f32.mrf.mxu2 }
  0xb6   :  { %v251_v45 = vadd.f32 %v250_v41, %v214_v43  ;;  %v456_v60 = vpop.f32.mrf.mxu1 }
  0xb8   :  { %v1081_v47 = vadd.f32 %v279_v44, %v251_v45 }
  0xb9   :  { %v431_v8 = vpop.f32.mrf.mxu0 }
  0xba   :  { %v831_v48 = vpop.eup %830  ;;  %v814_v49 = vmul.f32 -1.442695, %v1081_v47 }
  0xbb   :  { %v288_v50 = vadd.f32 1.0, %v831_v48  ;;  %v396_v51 = vpop.f32.mrf.mxu3 }
  0xbc   :  { %832 = vpow2.f32 %v814_v49  ;;  %v397_v55 = vadd.f32 %v396_v51, %v357_v46 }
  0xbd   :  { %834 = vrcp.f32 %v288_v50  ;;  %v365_v52 = vpop.f32.mrf.mxu2  ;;  %v301_v63 = vand.u32 2147483648, %v288_v50  ;;  %v299_v2 = vand.u32 2147483647, %v288_v50  ;;  %vm295_vm3 = vweird.f32 %v288_v50 }
  0xbe   :  { %v427_v62 = vadd.f32 %v426_v53, %v397_v55  ;;  %v462_v19 = vpop.f32.mrf.mxu1 }
  0xbf   :  { %v302_v7 = vor.u32 1.1754944e-38, %v301_v63  ;;  %vm300_vm5 = vcmp.eq.f32.partialorder %v299_v2, 8.507059e+37 }
  0xc0   :  { %v457_v4 = vadd.f32 %v456_v60, %v427_v62 }
  0xc2   :  { %v833_v54 = vpop.eup %832 }
  0xc3   :  { %v835_v56 = vpop.eup %834  ;;  %v289_v57 = vadd.f32 1.0, %v833_v54  ;;  %v400_v58 = vpop.f32.mrf.mxu3 }
  0xc4   :  { %v291_v59 = vmul.f32 %v835_v56, %v288_v50  ;;  %vm296_vm2 = vweird.f32 %v835_v56  ;;  %v401_v5 = vadd.f32 %v400_v58, %v365_v52 }
  0xc5   :  { %836 = vrcp.f32 %v289_v57  ;;  %v489_v0 = vpop.f32.mrf.mxu2  ;;  %vm297_vm4 = vmor %vm295_vm3, %vm296_vm2  ;;  %v316_v18 = vand.u32 2147483648, %v289_v57  ;;  %v314_v21 = vand.u32 2147483647, %v289_v57  ;;  %vm310_vm7 = vweird.f32 %v289_v57 }
  0xc6   :  { %v292_v61 = vsub.f32 1.0, %v291_v59  ;;  %v490_v12 = vadd.f32 %v489_v0, %v457_v4  ;;  %v432_v16 = vadd.f32 %v431_v8, %v401_v5 }
  0xc7   :  { %v317_v27 = vor.u32 1.1754944e-38, %v316_v18  ;;  %vm315_vm9 = vcmp.eq.f32.partialorder %v314_v21, 8.507059e+37 }
  0xc8   :  { %v293_v1 = vmul.f32 %v835_v56, %v292_v61  ;;  %v463_v25 = vadd.f32 %v462_v19, %v432_v16 }
  0xca   :  { %v294_v3 = vadd.f32 %v835_v56, %v293_v1 }
  0xcb   :  { %v837_v6 = vpop.eup %836  ;;  %v516_v9 = vpop.f32.mrf.mxu3 }
  0xcc   :  { %v298_v10 = vsel %vm297_vm4, %v835_v56, %v294_v3  ;;  %v306_v11 = vmul.f32 %v837_v6, %v289_v57  ;;  %v517_v17 = vadd.f32 %v516_v9, %v490_v12  ;;  %vm311_vm6 = vweird.f32 %v837_v6 }
  0xcd   :  { %v303_v13 = vsel %vm300_vm5, %v302_v7, %v298_v10  ;;  %v493_v23 = vpop.f32.mrf.mxu2  ;;  %vm312_vm8 = vmor %vm310_vm7, %vm311_vm6 }
  0xce   :  { %v320_v14 = vmul.f32 %v303_v13, %v276_v35  ;;  %v307_v15 = vsub.f32 1.0, %v306_v11  ;;  %v494_v31 = vadd.f32 %v493_v23, %v463_v25 }
  0xd0   :  { %v308_v20 = vmul.f32 %v837_v6, %v307_v15  ;;  %v523_v22 = vmul.f32 %v517_v17, %v320_v14 }
  0xd2   :  { %v309_v24 = vadd.f32 %v837_v6, %v308_v20  ;;  %v530_v26 = vsel %vm59_vm0, %v523_v22, 0 }
  0xd3   :  { %v555_v28 = vand.u32 4294901760, %v530_v26  ;;  %v520_v29 = vpop.f32.mrf.mxu3 }
  0xd4   :  { %v313_v30 = vsel %vm312_vm8, %v837_v6, %v309_v24  ;;  %v521_v35 = vadd.f32 %v520_v29, %v494_v31 }
  0xd5   :  { %v318_v32 = vsel %vm315_vm9, %v317_v27, %v313_v30  ;;  %v556_v33 = vsub.f32 %v530_v26, %v555_v28  ;;  %609 = vmatmul.f32.vlgmr.msrb.gmra.mxu1 %v555_v28 }
  0xd6   :  { %v321_v34 = vmul.f32 %v318_v32, %v1081_v47 }
  0xd7   :  { %643 = vmatmul.f32.vlgmr.msra.gmra.mxu2 %v556_v33  ;;  %v557_v36 = vand.u32 4294901760, %v556_v33 }
  0xd8   :  { %v524_v37 = vmul.f32 %v521_v35, %v321_v34 }
  0xd9   :  { %675 = vmatmul.f32.vlgmr.msra.gmra.mxu3 %v557_v36  ;;  %v558_v38 = vsub.f32 %v556_v33, %v557_v36 }
  0xda   :  { %v533_v39 = vsel %vm59_vm0, %v524_v37, 0 }
  0xdb   :  { %v563_v40 = vand.u32 4294901760, %v533_v39  ;;  %v559_v41 = vand.u32 4294901760, %v558_v38 }
  0xdd   :  { %560 = vmatmul.f32.vlgmr.msrb.gmra.mxu0 %v559_v41  ;;  %613 = vmatmul.f32.gmra.mxu1 %v563_v40  ;;  %v564_v42 = vsub.f32 %v533_v39, %v563_v40 }
  0xdf   :  { %648 = vmatmul.f32.gmra.mxu2 %v564_v42  ;;  %v565_v43 = vand.u32 4294901760, %v564_v42 }
  0xe1   :  { %681 = vmatmul.f32.gmra.mxu3 %v565_v43  ;;  %v566_v44 = vsub.f32 %v564_v42, %v565_v43 }
  0xe3   :  { %v567_v45 = vand.u32 4294901760, %v566_v44 }
  0xe5   :  { %568 = vmatmul.f32.gmra.mxu0 %v567_v45  ;;  %743 = vmatmul.f32.vlgmr.msra.gmra.mxu1 %v555_v28 }
  0xed   :  { %714 = vmatmul.f32.vlgmr.msra.gmra.mxu0 %v555_v28  ;;  %747 = vmatmul.f32.gmra.mxu1 %v563_v40 }
  0xf5   :  { %718 = vmatmul.f32.gmra.mxu0 %v563_v40 }
 0x152   :  { %v610_v46 = vpop.f32.mrf.mxu1 }
 0x15a   :  { %v561_v47 = vpop.f32.mrf.mxu0  ;;  %v614_v48 = vpop.f32.mrf.mxu1 }
 0x15b   :  { %v611_v49 = vadd.f32 %v610_v46, %v561_v47  ;;  %v644_v50 = vpop.f32.mrf.mxu2 }
 0x15c   :  { %v676_v53 = vpop.f32.mrf.mxu3 }
 0x15d   :  { %v645_v52 = vadd.f32 %v644_v50, %v611_v49 }
 0x15f   :  { %v677_v54 = vadd.f32 %v676_v53, %v645_v52 }
 0x162   :  { %v569_v51 = vpop.f32.mrf.mxu0  ;;  %v744_v56 = vpop.f32.mrf.mxu1 }
 0x163   :  { %v615_v55 = vadd.f32 %v614_v48, %v569_v51  ;;  %v649_v59 = vpop.f32.mrf.mxu2 }
 0x164   :  { %v682_v63 = vpop.f32.mrf.mxu3 }
 0x165   :  { %v650_v60 = vadd.f32 %v649_v59, %v615_v55 }
 0x167   :  { %v683_v0 = vadd.f32 %v682_v63, %v650_v60 }
 0x16a   :  { %v715_v57 = vpop.f32.mrf.mxu0  ;;  %v748_v3 = vpop.f32.mrf.mxu1 }
 0x16b   :  { %v716_v58 = vadd.f32 %v715_v57, %v677_v54 }
 0x16d   :  { %v745_v61 = vadd.f32 %v744_v56, %v716_v58 }
 0x16f   :  { %v815_v62 = vmul.f32 -1.442695, %v745_v61 }
 0x171   :  { %838 = vpow2.f32 %v815_v62 }
 0x172   :  { %v719_v1 = vpop.f32.mrf.mxu0 }
 0x173   :  { %v720_v2 = vadd.f32 %v719_v1, %v683_v0 }
 0x175   :  { %v749_v4 = vadd.f32 %v748_v3, %v720_v2 }
 0x177   :  { %v839_v5 = vpop.eup %838  ;;  %v816_v6 = vmul.f32 -1.442695, %v749_v4 }
 0x178   :  { %v757_v7 = vadd.f32 1.0, %v839_v5 }
 0x179   :  { %840 = vpow2.f32 %v816_v6 }
 0x17a   :  { %842 = vrcp.f32 %v757_v7  ;;  %v770_v13 = vand.u32 2147483648, %v757_v7  ;;  %v768_v15 = vand.u32 2147483647, %v757_v7  ;;  %vm764_vm11 = vweird.f32 %v757_v7 }
 0x17c   :  { %v771_v18 = vor.u32 1.1754944e-38, %v770_v13  ;;  %vm769_vm13 = vcmp.eq.f32.partialorder %v768_v15, 8.507059e+37 }
 0x17f   :  { %v841_v8 = vpop.eup %840 }
 0x180   :  { %v843_v9 = vpop.eup %842  ;;  %v758_v10 = vadd.f32 1.0, %v841_v8 }
 0x181   :  { %v760_v11 = vmul.f32 %v843_v9, %v757_v7  ;;  %vm765_vm10 = vweird.f32 %v843_v9 }
 0x182   :  { %844 = vrcp.f32 %v758_v10  ;;  %vm766_vm12 = vmor %vm764_vm11, %vm765_vm10  ;;  %v785_v24 = vand.u32 2147483648, %v758_v10  ;;  %v783_v26 = vand.u32 2147483647, %v758_v10  ;;  %vm779_vm15 = vweird.f32 %v758_v10 }
 0x183   :  { %v761_v12 = vsub.f32 1.0, %v760_v11 }
 0x184   :  { %v786_v28 = vor.u32 1.1754944e-38, %v785_v24  ;;  %vm784_vm2 = vcmp.eq.f32.partialorder %v783_v26, 8.507059e+37 }
 0x185   :  { %v762_v14 = vmul.f32 %v843_v9, %v761_v12 }
 0x187   :  { %v763_v16 = vadd.f32 %v843_v9, %v762_v14 }
 0x188   :  { %v845_v17 = vpop.eup %844 }
 0x189   :  { %v767_v19 = vsel %vm766_vm12, %v843_v9, %v763_v16  ;;  %v775_v20 = vmul.f32 %v845_v17, %v758_v10  ;;  %vm780_vm14 = vweird.f32 %v845_v17 }
 0x18a   :  { %v772_v21 = vsel %vm769_vm13, %v771_v18, %v767_v19  ;;  %vm781_vm0 = vmor %vm779_vm15, %vm780_vm14 }
 0x18b   :  { %v789_v22 = vmul.f32 %v772_v21, %v745_v61  ;;  %v776_v23 = vsub.f32 1.0, %v775_v20 }
 0x18d   :  { %791 = vst.msk [vmem:[#allocation7] sm:$0xff] %vm326_vm1, %v789_v22  ;;  %v777_v25 = vmul.f32 %v845_v17, %v776_v23 }
 0x18f   :  { %v778_v27 = vadd.f32 %v845_v17, %v777_v25 }
 0x191   :  { %v782_v29 = vsel %vm781_vm0, %v845_v17, %v778_v27 }
 0x192   :  { %v787_v30 = vsel %vm784_vm2, %v786_v28, %v782_v29 }
 0x193   :  { %v790_v31 = vmul.f32 %v787_v30, %v749_v4 }
 0x195   :  { %792 = vst.msk [vmem:[#allocation7 + $0x8] sm:$0xff] %vm326_vm1, %v790_v31 }
 0x196   :  { %805 = dma.vmem_to_hbm [thread:$0]  %s798_s21, 256, %s800_s24, [#allocation4], %s925_s26, %s925_s26, %s926_s27  }
 0x197   :  { %922 = dma.done.wait [#allocation4], 256  }
 0x198   :  { %923 = vsyncadd [#allocation4], 4294967040 }
 0x199   :  { %810 = vsyncpa [#allocation3], 1 }
 0x19a   :  { %811 = vsyncpa [#allocation6], 1 }
 0x19b   :  { %812 = vsyncpa [#allocation4], 1 }

</bundles_post_ra>
